<compile_context>
chip_gen: v6e
topology: v6e:2x2x1
jax: 0.10.0
libtpu: 0.0.40
codegen_flags: <defaults>
</compile_context>

<pallas_src>
import jax
import jax.numpy as jnp
from jax.experimental import pallas as pl
from jax.experimental.pallas import tpu as pltpu


_SMALL_BYTES = 1 << 20            # below this, fused XLA beats kernel dispatch
_TARGET_BLOCK_BYTES = 8 << 20     # ~8 MiB per tile; x4 w/ double-buffered in+out
_VMEM_LIMIT_BYTES = 48 * 1024 * 1024


# ---------------------------------------------------------------------------
# Backward Pallas kernel: o = neg_lambda * g  (neg_lambda is an SMEM scalar)
# ---------------------------------------------------------------------------
def _neg_scale_kernel(neg_lam_ref, g_ref, o_ref):
    lam = neg_lam_ref[0].astype(o_ref.dtype)     # runtime scalar from SMEM
    o_ref[...] = (g_ref[...] * lam).astype(o_ref.dtype)


def _choose_layout(n):
    """Widest lane-dense column count (multiple of 128) that divides n."""
    for cols in (4096, 2048, 1024, 512, 256, 128):
        if n % cols == 0:
            return n // cols, cols
    return None


def _pick_block_rows(rows, cols, itemsize):
    """Pick a sublane-aligned block_rows: big (~8 MiB), >=4 grid steps when
    possible, and preferably an exact divisor of rows (no partial tail)."""
    sublane_mult = max(8, 32 // max(1, itemsize))   # 8 f32 / 16 bf16 / 32 int8
    if rows <= sublane_mult:
        return rows                                  # full-dim block, always legal
    bytes_per_row = cols * itemsize
    cap = (_TARGET_BLOCK_BYTES // bytes_per_row) // sublane_mult * sublane_mult
    # Keep >= 4 grid steps when the slab is large enough: pipeline overlap and
    # work for both v7x TensorCores.
    quarter = (rows // 4) // sublane_mult * sublane_mult
    if quarter >= sublane_mult:
        cap = min(cap, quarter)
    cap = max(sublane_mult, min(cap, rows))
    # Prefer a block_rows that divides rows exactly (no masked partial tile).
    for br in range(cap, sublane_mult - 1, -sublane_mult):
        if rows % br == 0:
            return br
    return cap                                       # partial tail: Pallas masks OOB writes


def _reverse_grad_pallas(g, lambda_):
    """Compute (-lambda_) * g with a tiled, pipelined Pallas kernel."""
    dtype = g.dtype
    neg_lam = -jnp.asarray(lambda_, jnp.float32)
    n = g.size
    itemsize = jnp.dtype(dtype).itemsize

    layout = _choose_layout(n) if n * itemsize >= _SMALL_BYTES else None
    if layout is None:
        # Small grads, or sizes that are not a multiple of 128 lanes: a plain
        # fused XLA elementwise op is already at the HBM roofline.
        return (g.astype(jnp.float32) * neg_lam).astype(dtype)

    rows, cols = layout
    g2d = g.reshape(rows, cols)
    block_rows = _pick_block_rows(rows, cols, itemsize)
    grid = (pl.cdiv(rows, block_rows),)

    out2d = pl.pallas_call(
        _neg_scale_kernel,
        out_shape=jax.ShapeDtypeStruct((rows, cols), dtype),
        grid=grid,
        in_specs=[
            pl.BlockSpec(memory_space=pltpu.MemorySpace.SMEM),   # neg_lambda scalar
            pl.BlockSpec((block_rows, cols), lambda i: (i, 0)),  # gradient tiles
        ],
        out_specs=pl.BlockSpec((block_rows, cols), lambda i: (i, 0)),
        # Upstream gradient is dead after this op -> donate its buffer.
        input_output_aliases={1: 0},
        compiler_params=pltpu.CompilerParams(
            dimension_semantics=("parallel",),
            vmem_limit_bytes=_VMEM_LIMIT_BYTES,
        ),
    )(neg_lam.reshape(1), g2d)
    return out2d.reshape(g.shape)


# ---------------------------------------------------------------------------
# custom_vjp wrapper reproducing GradientReversalFunction semantics
# ---------------------------------------------------------------------------
@jax.custom_vjp
def _gradient_reversal_p(x, lambda_):
    # Forward is the identity: no kernel, no HBM traffic.
    return x


def _grl_fwd(x, lambda_):
    return x, lambda_


def _grl_bwd(lambda_, g):
    # Forward output does not depend on lambda -> its cotangent is exactly 0
    # (PyTorch returns None for it).
    return (_reverse_grad_pallas(g, lambda_), jnp.zeros_like(lambda_))


_gradient_reversal_p.defvjp(_grl_fwd, _grl_bwd)


def gradient_reversal(x, lambda_=1.0):
    return _gradient_reversal_p(x, jnp.asarray(lambda_, jnp.float32))


class GradientReversalLayer:
    """JAX/Pallas equivalent of the PyTorch GradientReversalLayer."""

    def __init__(self, lambda_=1.0):
        # Stored as a runtime f32 scalar: annealing lambda does not recompile
        # the Pallas kernel (it is an SMEM operand, not a baked constant).
        self.lambda_ = jnp.asarray(lambda_, jnp.float32)

    def __call__(self, x):
        return _gradient_reversal_p(x, self.lambda_)


# ---------------------------------------------------------------------------
# Demo / smoke test
# ---------------------------------------------------------------------------
if __name__ == "__main__":
    key = jax.random.PRNGKey(0)

    # Small NCHW input consistent with typical module usage.
    x = jax.random.normal(key, (2, 4, 16, 16), dtype=jnp.float32)
    layer = GradientReversalLayer(lambda_=1.0)

    # Forward: identity (no kernel).
    y = jax.block_until_ready(layer(x))
    assert y.shape == x.shape and y.dtype == x.dtype
    assert jnp.array_equal(y, x), "forward must be identity"

    # Backward on the small input: takes the fused-XLA fast path.
    grad = jax.grad(lambda inp: jnp.sum(layer(inp) * 2.0))(x)
    grad = jax.block_until_ready(grad)
    assert grad.shape == x.shape and grad.dtype == x.dtype
    assert jnp.allclose(grad, -2.0 * jnp.ones_like(x)), "backward must reverse gradient"

    # Larger gradient (2 MiB) exercises the Pallas kernel path.
    xb = jax.random.normal(jax.random.PRNGKey(1), (256, 2048), dtype=jnp.float32)
    grad_big = jax.grad(lambda inp: jnp.sum(layer(inp) * 2.0))(xb)
    grad_big = jax.block_until_ready(grad_big)
    assert jnp.allclose(grad_big, -2.0 * jnp.ones_like(xb)), "Pallas path incorrect"

    # Different (annealed) lambda: same compiled kernel, different SMEM scalar.
    layer2 = GradientReversalLayer(lambda_=0.5)
    grad_half = jax.grad(lambda inp: jnp.sum(layer2(inp) * 3.0))(xb)
    grad_half = jax.block_until_ready(grad_half)
    assert jnp.allclose(grad_half, -1.5 * jnp.ones_like(xb)), "lambda scaling incorrect"

    # bf16 gradient exercises the native-dtype multiply path.
    xbf = jax.random.normal(jax.random.PRNGKey(2), (256, 2048)).astype(jnp.bfloat16)
    grad_bf = jax.grad(lambda inp: jnp.sum(layer(inp) * 2.0))(xbf)
    grad_bf = jax.block_until_ready(grad_bf)
    assert grad_bf.dtype == jnp.bfloat16
    assert jnp.allclose(grad_bf.astype(jnp.float32),
                        -2.0 * jnp.ones((256, 2048), jnp.float32)), "bf16 path incorrect"

    print("KERNEL_OK")
</pallas_src>

<mosaic_0001>
module attributes {stable_mosaic.version = 11 : i64} {
  func.func @_neg_scale_kernel(%arg0: i32, %arg1: memref<1xf32, #tpu.memory_space<smem>>, %arg2: memref<32x4096xf32, #tpu.memory_space<vmem>>, %arg3: memref<32x4096xf32, #tpu.memory_space<vmem>>) attributes {dimension_semantics = [#tpu.dimension_semantics<parallel>], iteration_bounds = array<i64: 4>, scalar_prefetch = 0 : i64, scratch_operands = 0 : i64, tpu.core_type = #tpu.core_type<tc>, window_params = [{transform_indices = @transform_0, window_bounds = array<i64: 1>}, {transform_indices = @transform_1, window_bounds = array<i64: 32, 4096>}, {transform_indices = @transform_2, window_bounds = array<i64: 32, 4096>}]} {
    %c0 = arith.constant 0 : index
    %0 = memref.load %arg1[%c0] : memref<1xf32, #tpu.memory_space<smem>>
    %c0_0 = arith.constant 0 : index
    %c0_1 = arith.constant 0 : index
    %1 = vector.load %arg2[%c0_0, %c0_1] : memref<32x4096xf32, #tpu.memory_space<vmem>>, vector<32x4096xf32>
    %2 = vector.broadcast %0 : f32 to vector<32x4096xf32>
    %3 = arith.mulf %1, %2 : vector<32x4096xf32>
    %c0_2 = arith.constant 0 : index
    %c0_3 = arith.constant 0 : index
    %4 = vector.load %arg3[%c0_2, %c0_3] : memref<32x4096xf32, #tpu.memory_space<vmem>>, vector<32x4096xf32>
    tpu.vector_store %arg3[%c0_2, %c0_3], %3 {strides = array<i32>} : memref<32x4096xf32, #tpu.memory_space<vmem>>, vector<32x4096xf32>,
    return
  }
  func.func @transform_0(%arg0: i32) -> i32 {
    %c0_i32 = arith.constant 0 : i32
    %c0_i32_0 = arith.constant 0 : i32
    return %c0_i32 : i32
  }
  func.func @transform_1(%arg0: i32) -> (i32, i32) {
    %c0_i32 = arith.constant 0 : i32
    %c0_i32_0 = arith.constant 0 : i32
    return %arg0, %c0_i32 : i32, i32
  }
  func.func @transform_2(%arg0: i32) -> (i32, i32) {
    %c0_i32 = arith.constant 0 : i32
    %c0_i32_0 = arith.constant 0 : i32
    return %arg0, %c0_i32 : i32, i32
  }
}

</mosaic_0001>

<bundles_post_ra>
// kernel: tpu_custom_call.1
= control target key start
LH: loop header
LB: loop body
LE: loop exit
PB: predicated region body
PF: predicated region fallthrough
CT: control target
= control target key end

     0   :  { %s1371_s0 = inlined_call_operand.<no memory space> [shape: f32[1], index: 0, kind: input, shape index: {}]   ;;  %s1372_s1 = inlined_call_operand.hbm [shape: f32[128,4096], index: 1, kind: input, shape index: {}, may-alias: {1,2}]   ;;  %s1373_s2 = inlined_call_operand.hbm [shape: f32[128,4096], index: 2, kind: output, shape index: {}, may-alias: {1,2}]  }
   0x1   :  { %7 = sst [smem:[#allocation2]] %s1371_s0 }
   0x2   :  { %8 = vsyncpa [#allocation4], 0 }
   0x3   :  { %10 = vsyncpa [#allocation4 + $0x1], 0 }
   0x4   :  { %11 = vsyncpa [#allocation5], 0 }
   0x5   :  { %13 = vsyncpa [#allocation5 + $0x1], 0  ;;  %s828_s11 = smov 0   ;;  %s830_s12 = smov 0  }
   0x6   :  { %s832_s13 = smov 0   ;;  %s834_s14 = smov 0  }
   0x7 LB: > { %s849_s0 = sadd.s32 4294967295, %s802_s14   ;;  %s640_s15 = sadd.s32 4294967294, %s802_s14   ;;  %s802_s14 = sphi %s834_s14, %s1387_s14   ;;  %s798_s13 = sphi %s832_s13, %s1386_s13   ;;  %s794_s12 = sphi %s830_s12, %s1385_s12   ;;  %s790_s11 = sphi %s828_s11, %s1384_s11  }
   0x8   : > { %s853_s16 = sadd.s32 1, %s802_s14   ;;  %s47_s17 = sadd.s32 1, %s798_s13 }
   0x9   : > { %s44_s18 = ssub.s32 %s802_s14, %s853_s16  ;;  %p54_p0 = scmp.ne.s32.totalorder %s798_s13, %s794_s12 }
   0xa   : > { %p45_p1 = scmp.eq.s32.totalorder %s44_s18, 0  ;;  %p55_p2 = scmp.eq.s32.totalorder %s802_s14, 0 }
   0xb   : > { %p60_p3 = scmp.ne.s32.totalorder %s794_s12, %s790_s11  ;;  %p61_p4 = scmp.eq.s32.totalorder %s849_s0, 0 }
   0xc   : > { %s865_s19 = scalar_select %p45_p1, %s798_s13, %s47_s17  }
   0xd   : > { %p867_p5 = por %p55_p2, %p54_p0  ;;  %p871_p6 = por %p61_p4, %p60_p3 }
   0xe   : > { %p84_p7 = scmp.eq.s32.totalorder %s849_s0, 3  ;;  %p90_p8 = scmp.eq.s32.totalorder %s640_s15, 3 }
   0xf   : > { %s1377_s21 = scalar_select %p871_p6, 1, 0 }
  0x10   : > { %p672_p9 = scmp.lt.s32.totalorder %s802_s14, 4  ;;  %p877_p10 = por %p84_p7, %p54_p0 }
  0x11   : > { %p881_p11 = por %p90_p8, %p60_p3  ;;  %s113_s24 = sand.u32 1, %s798_s13  }
  0x12   : > { %s1378_s22 = scalar_select %p877_p10, 1, 0 }
  0x13   : > { %s1379_s23 = scalar_select %p881_p11, 1, 0 }
  0x14   : > { %s657_s25 = sshll.u32 %s802_s14, 14  ;;  %s643_s26 = sshll.u32 %s113_s24, 10 }
  0x15   : > { %s890_s29 = scalar_lea.hbm %s1372_s1, %s657_s25  ;;  %s117_s30 = scalar_lea.vmem [#allocation3], %s643_s26 }
  0x16   : > { %s125_s3 = sshll.u32 %s117_s30, 4  ;;  %p894_p12 = pnand %p672_p9, %p867_p5  ;;  %s898_s3 = int_to_ptr.vmem [resolvable:$true] %s125_s3 }
  0x17   : > { %s900_s5 = scalar_lea.sflag [#allocation4], %s113_s24  ;;  %s710_s6 = scalar_lea.hbm %s890_s29, 16384 }
  0x18   : > { %p711_p13 = scmp.ne.s32.totalorder %s890_s29, %s710_s6  ;;  %p712_p0 = pneg %p894_p12 }
  0x19   : > { %s715_s9 = scalar_lea.hbm %s1372_s1, 65536  ;;  %p716_p3 = scmp.lt.s32.totalorder %s890_s29, %s1372_s1 }
  0x1a   : > { %p713_p1 = pnand %p712_p0, %p711_p13  ;;  %p717_p4 = scmp.lt.s32.totalorder %s715_s9, %s710_s6 }
  0x1c   : > { %p714_p2 = pneg %p713_p1  ;;  %p718_p5 = por %p717_p4, %p716_p3 }
  0x1e   : > { %p719_p7 = pnand %p718_p5, %p714_p2 }
  0x20   : > { %722 = shalt.err (!%p719_p7)
}
  0x21   : > { %s723_s17 = scalar_lea.vmem %s898_s3, 16384  ;;  %s804_s18 = smov [#allocation3]  }
  0x22   : > { %p724_p8 = scmp.ne.s32.totalorder %s898_s3, %s723_s17  ;;  %s728_s20 = sshll.u32 %s804_s18, 4  ;;  %s729_s20 = int_to_ptr.vmem [resolvable:$false] %s728_s20 }
  0x23   : > { %s730_s24 = scalar_lea.vmem %s729_s20, 32768  ;;  %p731_p1 = scmp.lt.s32.totalorder %s898_s3, %s729_s20 }
  0x24   : > { %p726_p9 = pnand %p724_p8, %p712_p0  ;;  %p732_p11 = scmp.lt.s32.totalorder %s730_s24, %s723_s17 }
  0x26   : > { %p727_p13 = pneg %p726_p9  ;;  %p733_p10 = por %p732_p11, %p731_p1 }
  0x28   : > { %p734_p6 = pnand %p733_p10, %p727_p13 }
  0x2a   : > { %737 = shalt.err (!%p734_p6)
}
  0x2b   : > { %s805_s25 = smov 4096   ;;  %s806_s26 = smov 256  }
  0x2c   : > { %667 = dma.hbm_to_vmem [thread:$0]  (!%p894_p12), %s890_s29, 16384, %s898_s3, %s900_s5, %s805_s25, %s805_s25, %s806_s26  }
  0x2d   : > { %p647_p0 = scmp.ge.s32.totalorder %s802_s14, 1  ;;  %p133_p2 = scmp.lt.s32.totalorder %s802_s14, 5 }
  0x2f   : > { %p134_p3 = pnand %p647_p0, %p133_p2 }
  0x30   : > { %s924_s27 = sand.u32 (!%p134_p3), 1, %s794_s12   ;;  %p1381_p6 = scmp.ne.s32.totalorder (!%p134_p3), %s1377_s21, 0 }
  0x31   : > { %137 = sbr.rel (%p134_p3) target bundleno = 141 (0x8d), region = 28  ;;  %s648_s28 = sshll.u32 (!%p134_p3), %s924_s27, 10 }
  0x32   : > { %s140_s30 = scalar_lea.sflag (!%p134_p3), [#allocation4], %s924_s27  ;;  %s928_s6 = scalar_lea.vmem (!%p134_p3), [#allocation3], %s648_s28 }
  0x36   : > { %781 = dma.done.wait (%p1381_p6), %s140_s30, 16384  }
  0x37   : > { %783 = vsyncadd (%p1381_p6), %s140_s30, 4294950912  ;;  %s166_s29 = sld [smem:[#allocation2]]  ;;  %v167_v0 = vld [vmem:[%s928_s6] sm:$0xff]  ;;  %v168_v2 = vld [vmem:[%s928_s6 + $0x8] sm:$0xff]  ;;  %s951_s21 = scalar_lea.vmem [#allocation6], %s648_s28 }
  0x38   : > { %v169_v3 = vld [vmem:[%s928_s6 + $0x10] sm:$0xff]  ;;  %v170_v7 = vld [vmem:[%s928_s6 + $0x18] sm:$0xff]  ;;  %v171_v8 = vld [vmem:[%s928_s6 + $0x20] sm:$0xff]  ;;  %s659_s3 = sshll.u32 %s849_s0, 14  ;;  %s567_s4 = sshll.u32 %s951_s21, 4  ;;  %s1319_s4 = int_to_ptr.vmem [resolvable:$true] %s567_s4 }
  0x39   : > { %v172_v9 = vld [vmem:[%s928_s6 + $0x28] sm:$0xff]  ;;  %v173_v13 = vld [vmem:[%s928_s6 + $0x30] sm:$0xff]  ;;  %v174_v14 = vld [vmem:[%s928_s6 + $0x38] sm:$0xff]  ;;  %s1317_s7 = scalar_lea.hbm %s1373_s2, %s659_s3  ;;  %s553_s8 = scalar_lea.sflag [#allocation5], %s924_s27 }
  0x3a   : > { %v175_v15 = vld [vmem:[%s928_s6 + $0x40] sm:$0xff]  ;;  %v176_v19 = vld [vmem:[%s928_s6 + $0x48] sm:$0xff]  ;;  %v177_v20 = vld [vmem:[%s928_s6 + $0x50] sm:$0xff]  ;;  %s738_s9 = scalar_lea.vmem %s1319_s4, 16384  ;;  %p1382_p11 = scmp.ne.s32.totalorder %s1378_s22, 0 }
  0x3b   : > { %v178_v21 = vld [vmem:[%s928_s6 + $0x58] sm:$0xff]  ;;  %v179_v25 = vld [vmem:[%s928_s6 + $0x60] sm:$0xff]  ;;  %v180_v26 = vld [vmem:[%s928_s6 + $0x68] sm:$0xff]  ;;  %p739_p10 = scmp.ne.s32.totalorder %s1319_s4, %s738_s9  ;;  %s807_s10 = smov [#allocation6]  }
  0x3c   : > { %v181_v27 = vld [vmem:[%s928_s6 + $0x70] sm:$0xff]  ;;  %v182_v31 = vld [vmem:[%s928_s6 + $0x78] sm:$0xff]  ;;  %v183_v32 = vld [vmem:[%s928_s6 + $0x80] sm:$0xff]  ;;  %s742_s15 = sshll.u32 %s807_s10, 4  ;;  %s743_s15 = int_to_ptr.vmem [resolvable:$false] %s742_s15 }
  0x3d   : > { %v935_v1 = vstv %s166_s29  ;;  %v184_v33 = vld [vmem:[%s928_s6 + $0x88] sm:$0xff]  ;;  %v185_v37 = vld [vmem:[%s928_s6 + $0x90] sm:$0xff]  ;;  %v186_v38 = vld [vmem:[%s928_s6 + $0x98] sm:$0xff]  ;;  %p740_p12 = pnand %p739_p10, %p1382_p11  ;;  %s744_s17 = scalar_lea.vmem %s743_s15, 32768 }
  0x3e   : > { %v296_v4 = vmul.f32 %v935_v1, %v167_v0  ;;  %v297_v5 = vmul.f32 %v935_v1, %v168_v2  ;;  %v298_v6 = vmul.f32 %v935_v1, %v169_v3  ;;  %v299_v10 = vmul.f32 %v935_v1, %v170_v7  ;;  %v187_v39 = vld [vmem:[%s928_s6 + $0xa0] sm:$0xff]  ;;  %v188_v43 = vld [vmem:[%s928_s6 + $0xa8] sm:$0xff]  ;;  %v189_v44 = vld [vmem:[%s928_s6 + $0xb0] sm:$0xff]  ;;  %p745_p5 = scmp.lt.s32.totalorder %s1319_s4, %s743_s15  ;;  %p746_p7 = scmp.lt.s32.totalorder %s744_s17, %s738_s9 }
  0x3f   : > { %v300_v11 = vmul.f32 %v935_v1, %v171_v8  ;;  %v301_v12 = vmul.f32 %v935_v1, %v172_v9  ;;  %v302_v16 = vmul.f32 %v935_v1, %v173_v13  ;;  %v303_v17 = vmul.f32 %v935_v1, %v174_v14  ;;  %v190_v45 = vld [vmem:[%s928_s6 + $0xb8] sm:$0xff]  ;;  %v191_v49 = vld [vmem:[%s928_s6 + $0xc0] sm:$0xff]  ;;  %v192_v50 = vld [vmem:[%s928_s6 + $0xc8] sm:$0xff]  ;;  %p741_p4 = pneg %p740_p12 }
  0x40   : > { %424 = vst [vmem:[%s951_s21] sm:$0xff] %v296_v4  ;;  %425 = vst [vmem:[%s951_s21 + $0x8] sm:$0xff] %v297_v5  ;;  %v304_v18 = vmul.f32 %v935_v1, %v175_v15  ;;  %v305_v22 = vmul.f32 %v935_v1, %v176_v19  ;;  %v306_v23 = vmul.f32 %v935_v1, %v177_v20  ;;  %v193_v51 = vld [vmem:[%s928_s6 + $0xd0] sm:$0xff]  ;;  %v194_v55 = vld [vmem:[%s928_s6 + $0xd8] sm:$0xff]  ;;  %p747_p8 = por %p746_p7, %p745_p5 }
  0x41   : > { %426 = vst [vmem:[%s951_s21 + $0x10] sm:$0xff] %v298_v6  ;;  %427 = vst [vmem:[%s951_s21 + $0x18] sm:$0xff] %v299_v10  ;;  %v307_v24 = vmul.f32 %v935_v1, %v178_v21  ;;  %v308_v28 = vmul.f32 %v935_v1, %v179_v25  ;;  %v309_v29 = vmul.f32 %v935_v1, %v180_v26  ;;  %v195_v56 = vld [vmem:[%s928_s6 + $0xe0] sm:$0xff]  ;;  %v196_v57 = vld [vmem:[%s928_s6 + $0xe8] sm:$0xff] }
  0x42   : > { %428 = vst [vmem:[%s951_s21 + $0x20] sm:$0xff] %v300_v11  ;;  %429 = vst [vmem:[%s951_s21 + $0x28] sm:$0xff] %v301_v12  ;;  %v310_v30 = vmul.f32 %v935_v1, %v181_v27  ;;  %v311_v34 = vmul.f32 %v935_v1, %v182_v31  ;;  %v312_v35 = vmul.f32 %v935_v1, %v183_v32  ;;  %v197_v61 = vld [vmem:[%s928_s6 + $0xf0] sm:$0xff]  ;;  %v198_v62 = vld [vmem:[%s928_s6 + $0xf8] sm:$0xff]  ;;  %p748_p9 = pnand %p747_p8, %p741_p4 }
  0x43   : > { %430 = vst [vmem:[%s951_s21 + $0x30] sm:$0xff] %v302_v16  ;;  %431 = vst [vmem:[%s951_s21 + $0x38] sm:$0xff] %v303_v17  ;;  %v313_v36 = vmul.f32 %v935_v1, %v184_v33  ;;  %v314_v40 = vmul.f32 %v935_v1, %v185_v37  ;;  %v315_v41 = vmul.f32 %v935_v1, %v186_v38  ;;  %v199_v63 = vld [vmem:[%s928_s6 + $0x100] sm:$0xff]  ;;  %v200_v4 = vld [vmem:[%s928_s6 + $0x108] sm:$0xff] }
  0x44   : > { %432 = vst [vmem:[%s951_s21 + $0x40] sm:$0xff] %v304_v18  ;;  %433 = vst [vmem:[%s951_s21 + $0x48] sm:$0xff] %v305_v22  ;;  %v316_v42 = vmul.f32 %v935_v1, %v187_v39  ;;  %v317_v46 = vmul.f32 %v935_v1, %v188_v43  ;;  %v318_v47 = vmul.f32 %v935_v1, %v189_v44  ;;  %v201_v5 = vld [vmem:[%s928_s6 + $0x110] sm:$0xff]  ;;  %v202_v6 = vld [vmem:[%s928_s6 + $0x118] sm:$0xff] }
  0x45   : > { %434 = vst [vmem:[%s951_s21 + $0x50] sm:$0xff] %v306_v23  ;;  %435 = vst [vmem:[%s951_s21 + $0x58] sm:$0xff] %v307_v24  ;;  %v319_v48 = vmul.f32 %v935_v1, %v190_v45  ;;  %v320_v52 = vmul.f32 %v935_v1, %v191_v49  ;;  %v321_v53 = vmul.f32 %v935_v1, %v192_v50  ;;  %v203_v10 = vld [vmem:[%s928_s6 + $0x120] sm:$0xff]  ;;  %v204_v11 = vld [vmem:[%s928_s6 + $0x128] sm:$0xff] }
  0x46   : > { %436 = vst [vmem:[%s951_s21 + $0x60] sm:$0xff] %v308_v28  ;;  %437 = vst [vmem:[%s951_s21 + $0x68] sm:$0xff] %v309_v29  ;;  %v322_v54 = vmul.f32 %v935_v1, %v193_v51  ;;  %v323_v58 = vmul.f32 %v935_v1, %v194_v55  ;;  %v324_v59 = vmul.f32 %v935_v1, %v195_v56  ;;  %v205_v12 = vld [vmem:[%s928_s6 + $0x130] sm:$0xff]  ;;  %v206_v16 = vld [vmem:[%s928_s6 + $0x138] sm:$0xff] }
  0x47   : > { %438 = vst [vmem:[%s951_s21 + $0x70] sm:$0xff] %v310_v30  ;;  %439 = vst [vmem:[%s951_s21 + $0x78] sm:$0xff] %v311_v34  ;;  %v325_v60 = vmul.f32 %v935_v1, %v196_v57  ;;  %v326_v0 = vmul.f32 %v935_v1, %v197_v61  ;;  %v327_v2 = vmul.f32 %v935_v1, %v198_v62  ;;  %v207_v17 = vld [vmem:[%s928_s6 + $0x140] sm:$0xff]  ;;  %v208_v18 = vld [vmem:[%s928_s6 + $0x148] sm:$0xff] }
  0x48   : > { %440 = vst [vmem:[%s951_s21 + $0x80] sm:$0xff] %v312_v35  ;;  %441 = vst [vmem:[%s951_s21 + $0x88] sm:$0xff] %v313_v36  ;;  %v328_v3 = vmul.f32 %v935_v1, %v199_v63  ;;  %v329_v7 = vmul.f32 %v935_v1, %v200_v4  ;;  %v330_v8 = vmul.f32 %v935_v1, %v201_v5  ;;  %v209_v22 = vld [vmem:[%s928_s6 + $0x150] sm:$0xff]  ;;  %v210_v23 = vld [vmem:[%s928_s6 + $0x158] sm:$0xff] }
  0x49   : > { %442 = vst [vmem:[%s951_s21 + $0x90] sm:$0xff] %v314_v40  ;;  %443 = vst [vmem:[%s951_s21 + $0x98] sm:$0xff] %v315_v41  ;;  %v331_v9 = vmul.f32 %v935_v1, %v202_v6  ;;  %v332_v13 = vmul.f32 %v935_v1, %v203_v10  ;;  %v333_v14 = vmul.f32 %v935_v1, %v204_v11  ;;  %v211_v24 = vld [vmem:[%s928_s6 + $0x160] sm:$0xff]  ;;  %v212_v28 = vld [vmem:[%s928_s6 + $0x168] sm:$0xff] }
  0x4a   : > { %444 = vst [vmem:[%s951_s21 + $0xa0] sm:$0xff] %v316_v42  ;;  %445 = vst [vmem:[%s951_s21 + $0xa8] sm:$0xff] %v317_v46  ;;  %v334_v15 = vmul.f32 %v935_v1, %v205_v12  ;;  %v335_v19 = vmul.f32 %v935_v1, %v206_v16  ;;  %v336_v20 = vmul.f32 %v935_v1, %v207_v17  ;;  %v213_v29 = vld [vmem:[%s928_s6 + $0x170] sm:$0xff]  ;;  %v214_v30 = vld [vmem:[%s928_s6 + $0x178] sm:$0xff] }
  0x4b   : > { %446 = vst [vmem:[%s951_s21 + $0xb0] sm:$0xff] %v318_v47  ;;  %447 = vst [vmem:[%s951_s21 + $0xb8] sm:$0xff] %v319_v48  ;;  %v337_v21 = vmul.f32 %v935_v1, %v208_v18  ;;  %v338_v25 = vmul.f32 %v935_v1, %v209_v22  ;;  %v339_v26 = vmul.f32 %v935_v1, %v210_v23  ;;  %v215_v34 = vld [vmem:[%s928_s6 + $0x180] sm:$0xff]  ;;  %v216_v35 = vld [vmem:[%s928_s6 + $0x188] sm:$0xff] }
  0x4c   : > { %448 = vst [vmem:[%s951_s21 + $0xc0] sm:$0xff] %v320_v52  ;;  %449 = vst [vmem:[%s951_s21 + $0xc8] sm:$0xff] %v321_v53  ;;  %v340_v27 = vmul.f32 %v935_v1, %v211_v24  ;;  %v341_v31 = vmul.f32 %v935_v1, %v212_v28  ;;  %v342_v32 = vmul.f32 %v935_v1, %v213_v29  ;;  %v217_v36 = vld [vmem:[%s928_s6 + $0x190] sm:$0xff]  ;;  %v218_v40 = vld [vmem:[%s928_s6 + $0x198] sm:$0xff] }
  0x4d   : > { %450 = vst [vmem:[%s951_s21 + $0xd0] sm:$0xff] %v322_v54  ;;  %451 = vst [vmem:[%s951_s21 + $0xd8] sm:$0xff] %v323_v58  ;;  %v343_v33 = vmul.f32 %v935_v1, %v214_v30  ;;  %v344_v37 = vmul.f32 %v935_v1, %v215_v34  ;;  %v345_v38 = vmul.f32 %v935_v1, %v216_v35  ;;  %v219_v41 = vld [vmem:[%s928_s6 + $0x1a0] sm:$0xff]  ;;  %v220_v42 = vld [vmem:[%s928_s6 + $0x1a8] sm:$0xff] }
  0x4e   : > { %452 = vst [vmem:[%s951_s21 + $0xe0] sm:$0xff] %v324_v59  ;;  %453 = vst [vmem:[%s951_s21 + $0xe8] sm:$0xff] %v325_v60  ;;  %v346_v39 = vmul.f32 %v935_v1, %v217_v36  ;;  %v347_v43 = vmul.f32 %v935_v1, %v218_v40  ;;  %v348_v44 = vmul.f32 %v935_v1, %v219_v41  ;;  %v221_v46 = vld [vmem:[%s928_s6 + $0x1b0] sm:$0xff]  ;;  %v222_v47 = vld [vmem:[%s928_s6 + $0x1b8] sm:$0xff] }
  0x4f   : > { %454 = vst [vmem:[%s951_s21 + $0xf0] sm:$0xff] %v326_v0  ;;  %455 = vst [vmem:[%s951_s21 + $0xf8] sm:$0xff] %v327_v2  ;;  %v349_v45 = vmul.f32 %v935_v1, %v220_v42  ;;  %v223_v48 = vld [vmem:[%s928_s6 + $0x1c0] sm:$0xff]  ;;  %v350_v49 = vmul.f32 %v935_v1, %v221_v46  ;;  %v351_v50 = vmul.f32 %v935_v1, %v222_v47  ;;  %v224_v52 = vld [vmem:[%s928_s6 + $0x1c8] sm:$0xff] }
  0x50   : > { %456 = vst [vmem:[%s951_s21 + $0x100] sm:$0xff] %v328_v3  ;;  %457 = vst [vmem:[%s951_s21 + $0x108] sm:$0xff] %v329_v7  ;;  %v352_v51 = vmul.f32 %v935_v1, %v223_v48  ;;  %v225_v53 = vld [vmem:[%s928_s6 + $0x1d0] sm:$0xff]  ;;  %v226_v54 = vld [vmem:[%s928_s6 + $0x1d8] sm:$0xff]  ;;  %v353_v55 = vmul.f32 %v935_v1, %v224_v52 }
  0x51   : > { %458 = vst [vmem:[%s951_s21 + $0x110] sm:$0xff] %v330_v8  ;;  %459 = vst [vmem:[%s951_s21 + $0x118] sm:$0xff] %v331_v9  ;;  %v354_v56 = vmul.f32 %v935_v1, %v225_v53  ;;  %v355_v57 = vmul.f32 %v935_v1, %v226_v54  ;;  %v227_v58 = vld [vmem:[%s928_s6 + $0x1e0] sm:$0xff]  ;;  %v228_v59 = vld [vmem:[%s928_s6 + $0x1e8] sm:$0xff] }
  0x52   : > { %460 = vst [vmem:[%s951_s21 + $0x120] sm:$0xff] %v332_v13  ;;  %461 = vst [vmem:[%s951_s21 + $0x128] sm:$0xff] %v333_v14  ;;  %v229_v60 = vld [vmem:[%s928_s6 + $0x1f0] sm:$0xff]  ;;  %v356_v61 = vmul.f32 %v935_v1, %v227_v58  ;;  %v357_v62 = vmul.f32 %v935_v1, %v228_v59  ;;  %v230_v0 = vld [vmem:[%s928_s6 + $0x1f8] sm:$0xff] }
  0x53   : > { %462 = vst [vmem:[%s951_s21 + $0x130] sm:$0xff] %v334_v15  ;;  %463 = vst [vmem:[%s951_s21 + $0x138] sm:$0xff] %v335_v19  ;;  %v358_v63 = vmul.f32 %v935_v1, %v229_v60  ;;  %v231_v2 = vld [vmem:[%s928_s6 + $0x200] sm:$0xff]  ;;  %v232_v3 = vld [vmem:[%s928_s6 + $0x208] sm:$0xff]  ;;  %v359_v4 = vmul.f32 %v935_v1, %v230_v0 }
  0x54   : > { %464 = vst [vmem:[%s951_s21 + $0x140] sm:$0xff] %v336_v20  ;;  %465 = vst [vmem:[%s951_s21 + $0x148] sm:$0xff] %v337_v21  ;;  %v360_v5 = vmul.f32 %v935_v1, %v231_v2  ;;  %v361_v6 = vmul.f32 %v935_v1, %v232_v3  ;;  %v233_v7 = vld [vmem:[%s928_s6 + $0x210] sm:$0xff]  ;;  %v234_v8 = vld [vmem:[%s928_s6 + $0x218] sm:$0xff] }
  0x55   : > { %466 = vst [vmem:[%s951_s21 + $0x150] sm:$0xff] %v338_v25  ;;  %467 = vst [vmem:[%s951_s21 + $0x158] sm:$0xff] %v339_v26  ;;  %v235_v9 = vld [vmem:[%s928_s6 + $0x220] sm:$0xff]  ;;  %v362_v10 = vmul.f32 %v935_v1, %v233_v7  ;;  %v363_v11 = vmul.f32 %v935_v1, %v234_v8  ;;  %v236_v13 = vld [vmem:[%s928_s6 + $0x228] sm:$0xff] }
  0x56   : > { %468 = vst [vmem:[%s951_s21 + $0x160] sm:$0xff] %v340_v27  ;;  %469 = vst [vmem:[%s951_s21 + $0x168] sm:$0xff] %v341_v31  ;;  %v364_v12 = vmul.f32 %v935_v1, %v235_v9  ;;  %v237_v14 = vld [vmem:[%s928_s6 + $0x230] sm:$0xff]  ;;  %v238_v15 = vld [vmem:[%s928_s6 + $0x238] sm:$0xff]  ;;  %v365_v16 = vmul.f32 %v935_v1, %v236_v13 }
  0x57   : > { %470 = vst [vmem:[%s951_s21 + $0x170] sm:$0xff] %v342_v32  ;;  %471 = vst [vmem:[%s951_s21 + $0x178] sm:$0xff] %v343_v33  ;;  %v366_v17 = vmul.f32 %v935_v1, %v237_v14  ;;  %v367_v18 = vmul.f32 %v935_v1, %v238_v15  ;;  %v239_v19 = vld [vmem:[%s928_s6 + $0x240] sm:$0xff]  ;;  %v240_v20 = vld [vmem:[%s928_s6 + $0x248] sm:$0xff] }
  0x58   : > { %472 = vst [vmem:[%s951_s21 + $0x180] sm:$0xff] %v344_v37  ;;  %473 = vst [vmem:[%s951_s21 + $0x188] sm:$0xff] %v345_v38  ;;  %v241_v21 = vld [vmem:[%s928_s6 + $0x250] sm:$0xff]  ;;  %v368_v22 = vmul.f32 %v935_v1, %v239_v19  ;;  %v369_v23 = vmul.f32 %v935_v1, %v240_v20  ;;  %v242_v25 = vld [vmem:[%s928_s6 + $0x258] sm:$0xff] }
  0x59   : > { %474 = vst [vmem:[%s951_s21 + $0x190] sm:$0xff] %v346_v39  ;;  %475 = vst [vmem:[%s951_s21 + $0x198] sm:$0xff] %v347_v43  ;;  %v370_v24 = vmul.f32 %v935_v1, %v241_v21  ;;  %v243_v26 = vld [vmem:[%s928_s6 + $0x260] sm:$0xff]  ;;  %v244_v27 = vld [vmem:[%s928_s6 + $0x268] sm:$0xff]  ;;  %v371_v28 = vmul.f32 %v935_v1, %v242_v25 }
  0x5a   : > { %476 = vst [vmem:[%s951_s21 + $0x1a0] sm:$0xff] %v348_v44  ;;  %477 = vst [vmem:[%s951_s21 + $0x1a8] sm:$0xff] %v349_v45  ;;  %v372_v29 = vmul.f32 %v935_v1, %v243_v26  ;;  %v373_v30 = vmul.f32 %v935_v1, %v244_v27  ;;  %v245_v31 = vld [vmem:[%s928_s6 + $0x270] sm:$0xff]  ;;  %v246_v32 = vld [vmem:[%s928_s6 + $0x278] sm:$0xff] }
  0x5b   : > { %478 = vst [vmem:[%s951_s21 + $0x1b0] sm:$0xff] %v350_v49  ;;  %479 = vst [vmem:[%s951_s21 + $0x1b8] sm:$0xff] %v351_v50  ;;  %v247_v33 = vld [vmem:[%s928_s6 + $0x280] sm:$0xff]  ;;  %v374_v34 = vmul.f32 %v935_v1, %v245_v31  ;;  %v375_v35 = vmul.f32 %v935_v1, %v246_v32  ;;  %v248_v37 = vld [vmem:[%s928_s6 + $0x288] sm:$0xff] }
  0x5c   : > { %480 = vst [vmem:[%s951_s21 + $0x1c0] sm:$0xff] %v352_v51  ;;  %481 = vst [vmem:[%s951_s21 + $0x1c8] sm:$0xff] %v353_v55  ;;  %v376_v36 = vmul.f32 %v935_v1, %v247_v33  ;;  %v249_v38 = vld [vmem:[%s928_s6 + $0x290] sm:$0xff]  ;;  %v250_v39 = vld [vmem:[%s928_s6 + $0x298] sm:$0xff]  ;;  %v377_v40 = vmul.f32 %v935_v1, %v248_v37 }
  0x5d   : > { %482 = vst [vmem:[%s951_s21 + $0x1d0] sm:$0xff] %v354_v56  ;;  %483 = vst [vmem:[%s951_s21 + $0x1d8] sm:$0xff] %v355_v57  ;;  %v378_v41 = vmul.f32 %v935_v1, %v249_v38  ;;  %v379_v42 = vmul.f32 %v935_v1, %v250_v39  ;;  %v251_v43 = vld [vmem:[%s928_s6 + $0x2a0] sm:$0xff]  ;;  %v252_v44 = vld [vmem:[%s928_s6 + $0x2a8] sm:$0xff] }
  0x5e   : > { %484 = vst [vmem:[%s951_s21 + $0x1e0] sm:$0xff] %v356_v61  ;;  %485 = vst [vmem:[%s951_s21 + $0x1e8] sm:$0xff] %v357_v62  ;;  %v253_v45 = vld [vmem:[%s928_s6 + $0x2b0] sm:$0xff]  ;;  %v380_v46 = vmul.f32 %v935_v1, %v251_v43  ;;  %v381_v47 = vmul.f32 %v935_v1, %v252_v44  ;;  %v254_v49 = vld [vmem:[%s928_s6 + $0x2b8] sm:$0xff] }
  0x5f   : > { %486 = vst [vmem:[%s951_s21 + $0x1f0] sm:$0xff] %v358_v63  ;;  %487 = vst [vmem:[%s951_s21 + $0x1f8] sm:$0xff] %v359_v4  ;;  %v382_v48 = vmul.f32 %v935_v1, %v253_v45  ;;  %v255_v50 = vld [vmem:[%s928_s6 + $0x2c0] sm:$0xff]  ;;  %v256_v51 = vld [vmem:[%s928_s6 + $0x2c8] sm:$0xff]  ;;  %v383_v52 = vmul.f32 %v935_v1, %v254_v49 }
  0x60   : > { %488 = vst [vmem:[%s951_s21 + $0x200] sm:$0xff] %v360_v5  ;;  %489 = vst [vmem:[%s951_s21 + $0x208] sm:$0xff] %v361_v6  ;;  %v384_v53 = vmul.f32 %v935_v1, %v255_v50  ;;  %v385_v54 = vmul.f32 %v935_v1, %v256_v51  ;;  %v257_v55 = vld [vmem:[%s928_s6 + $0x2d0] sm:$0xff]  ;;  %v258_v56 = vld [vmem:[%s928_s6 + $0x2d8] sm:$0xff] }
  0x61   : > { %490 = vst [vmem:[%s951_s21 + $0x210] sm:$0xff] %v362_v10  ;;  %491 = vst [vmem:[%s951_s21 + $0x218] sm:$0xff] %v363_v11  ;;  %v259_v57 = vld [vmem:[%s928_s6 + $0x2e0] sm:$0xff]  ;;  %v386_v58 = vmul.f32 %v935_v1, %v257_v55  ;;  %v387_v59 = vmul.f32 %v935_v1, %v258_v56  ;;  %v260_v61 = vld [vmem:[%s928_s6 + $0x2e8] sm:$0xff] }
  0x62   : > { %492 = vst [vmem:[%s951_s21 + $0x220] sm:$0xff] %v364_v12  ;;  %493 = vst [vmem:[%s951_s21 + $0x228] sm:$0xff] %v365_v16  ;;  %v388_v60 = vmul.f32 %v935_v1, %v259_v57  ;;  %v261_v62 = vld [vmem:[%s928_s6 + $0x2f0] sm:$0xff]  ;;  %v262_v63 = vld [vmem:[%s928_s6 + $0x2f8] sm:$0xff]  ;;  %v389_v0 = vmul.f32 %v935_v1, %v260_v61 }
  0x63   : > { %494 = vst [vmem:[%s951_s21 + $0x230] sm:$0xff] %v366_v17  ;;  %495 = vst [vmem:[%s951_s21 + $0x238] sm:$0xff] %v367_v18  ;;  %v390_v2 = vmul.f32 %v935_v1, %v261_v62  ;;  %v391_v3 = vmul.f32 %v935_v1, %v262_v63  ;;  %v263_v4 = vld [vmem:[%s928_s6 + $0x300] sm:$0xff]  ;;  %v264_v5 = vld [vmem:[%s928_s6 + $0x308] sm:$0xff] }
  0x64   : > { %496 = vst [vmem:[%s951_s21 + $0x240] sm:$0xff] %v368_v22  ;;  %497 = vst [vmem:[%s951_s21 + $0x248] sm:$0xff] %v369_v23  ;;  %v265_v6 = vld [vmem:[%s928_s6 + $0x310] sm:$0xff]  ;;  %v392_v7 = vmul.f32 %v935_v1, %v263_v4  ;;  %v393_v8 = vmul.f32 %v935_v1, %v264_v5  ;;  %v266_v10 = vld [vmem:[%s928_s6 + $0x318] sm:$0xff] }
  0x65   : > { %498 = vst [vmem:[%s951_s21 + $0x250] sm:$0xff] %v370_v24  ;;  %499 = vst [vmem:[%s951_s21 + $0x258] sm:$0xff] %v371_v28  ;;  %v394_v9 = vmul.f32 %v935_v1, %v265_v6  ;;  %v267_v11 = vld [vmem:[%s928_s6 + $0x320] sm:$0xff]  ;;  %v268_v12 = vld [vmem:[%s928_s6 + $0x328] sm:$0xff]  ;;  %v395_v13 = vmul.f32 %v935_v1, %v266_v10 }
  0x66   : > { %500 = vst [vmem:[%s951_s21 + $0x260] sm:$0xff] %v372_v29  ;;  %501 = vst [vmem:[%s951_s21 + $0x268] sm:$0xff] %v373_v30  ;;  %v396_v14 = vmul.f32 %v935_v1, %v267_v11  ;;  %v397_v15 = vmul.f32 %v935_v1, %v268_v12  ;;  %v269_v16 = vld [vmem:[%s928_s6 + $0x330] sm:$0xff]  ;;  %v270_v17 = vld [vmem:[%s928_s6 + $0x338] sm:$0xff] }
  0x67   : > { %502 = vst [vmem:[%s951_s21 + $0x270] sm:$0xff] %v374_v34  ;;  %503 = vst [vmem:[%s951_s21 + $0x278] sm:$0xff] %v375_v35  ;;  %v271_v18 = vld [vmem:[%s928_s6 + $0x340] sm:$0xff]  ;;  %v398_v19 = vmul.f32 %v935_v1, %v269_v16  ;;  %v399_v20 = vmul.f32 %v935_v1, %v270_v17  ;;  %v272_v22 = vld [vmem:[%s928_s6 + $0x348] sm:$0xff] }
  0x68   : > { %504 = vst [vmem:[%s951_s21 + $0x280] sm:$0xff] %v376_v36  ;;  %505 = vst [vmem:[%s951_s21 + $0x288] sm:$0xff] %v377_v40  ;;  %v400_v21 = vmul.f32 %v935_v1, %v271_v18  ;;  %v273_v23 = vld [vmem:[%s928_s6 + $0x350] sm:$0xff]  ;;  %v274_v24 = vld [vmem:[%s928_s6 + $0x358] sm:$0xff]  ;;  %v401_v25 = vmul.f32 %v935_v1, %v272_v22 }
  0x69   : > { %506 = vst [vmem:[%s951_s21 + $0x290] sm:$0xff] %v378_v41  ;;  %507 = vst [vmem:[%s951_s21 + $0x298] sm:$0xff] %v379_v42  ;;  %v402_v26 = vmul.f32 %v935_v1, %v273_v23  ;;  %v403_v27 = vmul.f32 %v935_v1, %v274_v24  ;;  %v275_v28 = vld [vmem:[%s928_s6 + $0x360] sm:$0xff]  ;;  %v276_v29 = vld [vmem:[%s928_s6 + $0x368] sm:$0xff] }
  0x6a   : > { %508 = vst [vmem:[%s951_s21 + $0x2a0] sm:$0xff] %v380_v46  ;;  %509 = vst [vmem:[%s951_s21 + $0x2a8] sm:$0xff] %v381_v47  ;;  %v277_v30 = vld [vmem:[%s928_s6 + $0x370] sm:$0xff]  ;;  %v404_v31 = vmul.f32 %v935_v1, %v275_v28  ;;  %v405_v32 = vmul.f32 %v935_v1, %v276_v29  ;;  %v278_v34 = vld [vmem:[%s928_s6 + $0x378] sm:$0xff] }
  0x6b   : > { %510 = vst [vmem:[%s951_s21 + $0x2b0] sm:$0xff] %v382_v48  ;;  %511 = vst [vmem:[%s951_s21 + $0x2b8] sm:$0xff] %v383_v52  ;;  %v406_v33 = vmul.f32 %v935_v1, %v277_v30  ;;  %v279_v35 = vld [vmem:[%s928_s6 + $0x380] sm:$0xff]  ;;  %v280_v36 = vld [vmem:[%s928_s6 + $0x388] sm:$0xff]  ;;  %v407_v37 = vmul.f32 %v935_v1, %v278_v34 }
  0x6c   : > { %512 = vst [vmem:[%s951_s21 + $0x2c0] sm:$0xff] %v384_v53  ;;  %513 = vst [vmem:[%s951_s21 + $0x2c8] sm:$0xff] %v385_v54  ;;  %v408_v38 = vmul.f32 %v935_v1, %v279_v35  ;;  %v409_v39 = vmul.f32 %v935_v1, %v280_v36  ;;  %v281_v40 = vld [vmem:[%s928_s6 + $0x390] sm:$0xff]  ;;  %v282_v41 = vld [vmem:[%s928_s6 + $0x398] sm:$0xff] }
  0x6d   : > { %514 = vst [vmem:[%s951_s21 + $0x2d0] sm:$0xff] %v386_v58  ;;  %515 = vst [vmem:[%s951_s21 + $0x2d8] sm:$0xff] %v387_v59  ;;  %v283_v42 = vld [vmem:[%s928_s6 + $0x3a0] sm:$0xff]  ;;  %v410_v43 = vmul.f32 %v935_v1, %v281_v40  ;;  %v411_v44 = vmul.f32 %v935_v1, %v282_v41  ;;  %v284_v46 = vld [vmem:[%s928_s6 + $0x3a8] sm:$0xff] }
  0x6e   : > { %516 = vst [vmem:[%s951_s21 + $0x2e0] sm:$0xff] %v388_v60  ;;  %517 = vst [vmem:[%s951_s21 + $0x2e8] sm:$0xff] %v389_v0  ;;  %v412_v45 = vmul.f32 %v935_v1, %v283_v42  ;;  %v285_v47 = vld [vmem:[%s928_s6 + $0x3b0] sm:$0xff]  ;;  %v286_v48 = vld [vmem:[%s928_s6 + $0x3b8] sm:$0xff]  ;;  %v413_v49 = vmul.f32 %v935_v1, %v284_v46 }
  0x6f   : > { %518 = vst [vmem:[%s951_s21 + $0x2f0] sm:$0xff] %v390_v2  ;;  %519 = vst [vmem:[%s951_s21 + $0x2f8] sm:$0xff] %v391_v3  ;;  %v414_v50 = vmul.f32 %v935_v1, %v285_v47  ;;  %v415_v51 = vmul.f32 %v935_v1, %v286_v48  ;;  %v287_v52 = vld [vmem:[%s928_s6 + $0x3c0] sm:$0xff]  ;;  %v288_v53 = vld [vmem:[%s928_s6 + $0x3c8] sm:$0xff] }
  0x70   : > { %520 = vst [vmem:[%s951_s21 + $0x300] sm:$0xff] %v392_v7  ;;  %521 = vst [vmem:[%s951_s21 + $0x308] sm:$0xff] %v393_v8  ;;  %v289_v54 = vld [vmem:[%s928_s6 + $0x3d0] sm:$0xff]  ;;  %v416_v55 = vmul.f32 %v935_v1, %v287_v52  ;;  %v417_v56 = vmul.f32 %v935_v1, %v288_v53  ;;  %v290_v58 = vld [vmem:[%s928_s6 + $0x3d8] sm:$0xff] }
  0x71   : > { %522 = vst [vmem:[%s951_s21 + $0x310] sm:$0xff] %v394_v9  ;;  %523 = vst [vmem:[%s951_s21 + $0x318] sm:$0xff] %v395_v13  ;;  %v418_v57 = vmul.f32 %v935_v1, %v289_v54  ;;  %v291_v59 = vld [vmem:[%s928_s6 + $0x3e0] sm:$0xff]  ;;  %v292_v60 = vld [vmem:[%s928_s6 + $0x3e8] sm:$0xff]  ;;  %v419_v61 = vmul.f32 %v935_v1, %v290_v58 }
  0x72   : > { %524 = vst [vmem:[%s951_s21 + $0x320] sm:$0xff] %v396_v14  ;;  %525 = vst [vmem:[%s951_s21 + $0x328] sm:$0xff] %v397_v15  ;;  %v420_v62 = vmul.f32 %v935_v1, %v291_v59  ;;  %v421_v63 = vmul.f32 %v935_v1, %v292_v60  ;;  %v293_v0 = vld [vmem:[%s928_s6 + $0x3f0] sm:$0xff]  ;;  %v294_v2 = vld [vmem:[%s928_s6 + $0x3f8] sm:$0xff] }
  0x73   : > { %526 = vst [vmem:[%s951_s21 + $0x330] sm:$0xff] %v398_v19  ;;  %527 = vst [vmem:[%s951_s21 + $0x338] sm:$0xff] %v399_v20  ;;  %v422_v3 = vmul.f32 %v935_v1, %v293_v0  ;;  %v423_v4 = vmul.f32 %v935_v1, %v294_v2 }
  0x74   : > { %528 = vst [vmem:[%s951_s21 + $0x340] sm:$0xff] %v400_v21  ;;  %529 = vst [vmem:[%s951_s21 + $0x348] sm:$0xff] %v401_v25 }
  0x75   : > { %530 = vst [vmem:[%s951_s21 + $0x350] sm:$0xff] %v402_v26  ;;  %531 = vst [vmem:[%s951_s21 + $0x358] sm:$0xff] %v403_v27 }
  0x76   : > { %532 = vst [vmem:[%s951_s21 + $0x360] sm:$0xff] %v404_v31  ;;  %533 = vst [vmem:[%s951_s21 + $0x368] sm:$0xff] %v405_v32 }
  0x77   : > { %534 = vst [vmem:[%s951_s21 + $0x370] sm:$0xff] %v406_v33  ;;  %535 = vst [vmem:[%s951_s21 + $0x378] sm:$0xff] %v407_v37 }
  0x78   : > { %536 = vst [vmem:[%s951_s21 + $0x380] sm:$0xff] %v408_v38  ;;  %537 = vst [vmem:[%s951_s21 + $0x388] sm:$0xff] %v409_v39 }
  0x79   : > { %538 = vst [vmem:[%s951_s21 + $0x390] sm:$0xff] %v410_v43  ;;  %539 = vst [vmem:[%s951_s21 + $0x398] sm:$0xff] %v411_v44 }
  0x7a   : > { %540 = vst [vmem:[%s951_s21 + $0x3a0] sm:$0xff] %v412_v45  ;;  %541 = vst [vmem:[%s951_s21 + $0x3a8] sm:$0xff] %v413_v49 }
  0x7b   : > { %542 = vst [vmem:[%s951_s21 + $0x3b0] sm:$0xff] %v414_v50  ;;  %543 = vst [vmem:[%s951_s21 + $0x3b8] sm:$0xff] %v415_v51 }
  0x7c   : > { %544 = vst [vmem:[%s951_s21 + $0x3c0] sm:$0xff] %v416_v55  ;;  %545 = vst [vmem:[%s951_s21 + $0x3c8] sm:$0xff] %v417_v56 }
  0x7d   : > { %546 = vst [vmem:[%s951_s21 + $0x3d0] sm:$0xff] %v418_v57  ;;  %547 = vst [vmem:[%s951_s21 + $0x3d8] sm:$0xff] %v419_v61 }
  0x7e   : > { %548 = vst [vmem:[%s951_s21 + $0x3e0] sm:$0xff] %v420_v62  ;;  %549 = vst [vmem:[%s951_s21 + $0x3e8] sm:$0xff] %v421_v63 }
  0x7f   : > { %550 = vst [vmem:[%s951_s21 + $0x3f0] sm:$0xff] %v422_v3  ;;  %551 = vst [vmem:[%s951_s21 + $0x3f8] sm:$0xff] %v423_v4 }
  0x80   : > { %751 = shalt.err (!%p748_p9)
}
  0x81   : > { %s752_s18 = scalar_lea.hbm %s1317_s7, 16384  ;;  %s756_s25 = scalar_lea.hbm %s1373_s2, 65536 }
  0x82   : > { %p753_p13 = scmp.ne.s32.totalorder %s1317_s7, %s752_s18  ;;  %p757_p2 = scmp.lt.s32.totalorder %s1317_s7, %s1373_s2 }
  0x83   : > { %p758_p3 = scmp.lt.s32.totalorder %s756_s25, %s752_s18 }
  0x84   : > { %p754_p1 = pnand %p753_p13, %p1382_p11 }
  0x85   : > { %p759_p6 = por %p758_p3, %p757_p2 }
  0x86   : > { %p755_p0 = pneg %p754_p1 }
  0x88   : > { %p760_p10 = pnand %p759_p6, %p755_p0 }
  0x8a   : > { %763 = shalt.err (!%p760_p10)
}
  0x8b   : > { %s808_s30 = smov 4096   ;;  %s809_s6 = smov 256  }
  0x8c   : > { %662 = dma.vmem_to_hbm [thread:$0]  (%p1382_p11), %s1319_s4, 16384, %s1317_s7, %s553_s8, %s808_s30, %s808_s30, %s809_s6  }
  0x8d PF: > { %p673_p12 = scmp.ge.s32.totalorder %s802_s14, 2  ;;  %s582_s29 = sand.u32 1, %s790_s11  }
  0x8e   : > { %p1383_p4 = scmp.ne.s32.totalorder %s1379_s23, 0  ;;  %s583_s21 = scalar_lea.sflag [#allocation5], %s582_s29 }
  0x90   : > { %p669_p5 = pnand %p673_p12, %p1383_p4 }
  0x92   : > { %p670_p7 = pneg %p669_p5 }
  0x94   : > { %785 = dma.done.wait (%p670_p7), %s583_s21, 16384  }
  0x95   : > { %787 = vsyncadd (%p670_p7), %s583_s21, 4294950912  ;;  %p16_p8 = scmp.ge.s32.totalorder %s853_s16, 6   ;;  %s1384_s11 = smov %s794_s12 }
  0x96   : > { %s1385_s12 = smov %s798_s13  ;;  %s1386_s13 = smov %s865_s19 }
  0x97   : > { %s1387_s14 = smov %s853_s16  ;;  %18 = sbr.rel (!%p16_p8) target bundleno = 7 (0x7), region = 73 }
  0x9c   :  { %588 = vsyncpa [#allocation4], 1 }
  0x9d   :  { %590 = vsyncpa [#allocation4 + $0x1], 1 }
  0x9e   :  { %591 = vsyncpa [#allocation5], 1 }
  0x9f   :  { %593 = vsyncpa [#allocation5 + $0x1], 1 }

</bundles_post_ra>
